<compile_context>
chip_gen: v6e
topology: v6e:2x2x1
jax: 0.10.0
libtpu: 0.0.40
codegen_flags: <defaults>
</compile_context>

<pallas_src>
import math

import jax
import jax.numpy as jnp
from jax.experimental import pallas as pl
from jax.experimental.pallas import tpu as pltpu


def _round_up(x: int, m: int) -> int:
    return ((x + m - 1) // m) * m


def _largest_tile(dim_padded: int, pref: int) -> int:
    """Largest multiple of 128 that divides dim_padded and is <= pref (min 128)."""
    best = 128
    t = 128
    limit = min(pref, dim_padded)
    while t <= limit:
        if dim_padded % t == 0:
            best = t
        t += 128
    return best


def _vmem_cap_bytes() -> int:
    """~75% of physical VMEM per TensorCore (leave headroom for compiler scratch)."""
    try:
        phys = int(pltpu.get_tpu_info().vmem_capacity_bytes)
    except Exception:  # non-TPU trace context / older jax: assume v7x (smallest)
        phys = 64 * 1024 * 1024
    return (phys * 3) // 4


# ----------------------------------------------------------------------------
# Kernels
# ----------------------------------------------------------------------------

def _relu_mm_kernel(x_ref, w_ref, o_ref):
    """Single-shot tile: o = relu(x @ w). Used by the weight-resident and
    single-K paths (no accumulator scratch, no init/finalize branches)."""
    o_ref[...] = jnp.maximum(
        jnp.dot(x_ref[...], w_ref[...], preferred_element_type=jnp.float32),
        0.0,
    ).astype(o_ref.dtype)


def _relu_mm_acc_kernel(x_ref, w_ref, o_ref, acc_ref):
    """General K-reduction path: f32 VMEM accumulator, ReLU on the last K step."""
    k = pl.program_id(2)

    @pl.when(k == 0)
    def _init():
        acc_ref[...] = jnp.zeros_like(acc_ref)

    acc_ref[...] += jnp.dot(
        x_ref[...], w_ref[...], preferred_element_type=jnp.float32
    )

    @pl.when(k == pl.num_programs(2) - 1)
    def _finalize():
        o_ref[...] = jnp.maximum(acc_ref[...], 0.0).astype(o_ref.dtype)


# ----------------------------------------------------------------------------
# Host-side wrapper
# ----------------------------------------------------------------------------

def _forward_prepared(
    x,
    w_padded,          # (Kp, Np), already in compute_dtype, 128-padded
    true_n: int,
    *,
    out_dtype,
    tile_m: int,
    tile_n: int,
    tile_k: int,
    compute_dtype,
    _force_path=None,  # None | "resident" | "single_k" | "tiled" (testing knob)
):
    M, K = x.shape
    Kp, Np = w_padded.shape
    assert _round_up(K, 128) == Kp, "prepared weight does not match x inner dim"

    csize = jnp.dtype(compute_dtype).itemsize
    osize = jnp.dtype(out_dtype).itemsize

    Mp = _round_up(M, 128)
    xc = x.astype(compute_dtype)
    if (Mp, Kp) != (M, K):
        # No-op when x is already aligned; padded K columns contribute 0.
        xc = jnp.pad(xc, ((0, Mp - M), (0, Kp - K)))

    # Tiles are divisors of the 128-padded dims -> zero extra padding waste.
    tm = _largest_tile(Mp, tile_m)
    tn = _largest_tile(Np, tile_n)

    cap = _vmem_cap_bytes()

    # VMEM estimates (double-buffered operands + f32 accumulator / intermediate).
    est_resident = (2 * tm * Kp * csize + 2 * Kp * Np * csize
                    + 2 * tm * Np * osize + tm * Np * 4)
    est_single = (2 * tm * Kp * csize + 2 * Kp * tn * csize
                  + 2 * tm * tn * osize + tm * tn * 4)

    if _force_path is not None:
        path = _force_path
    elif est_resident <= cap // 2:
        path = "resident"
    elif est_single <= cap // 2:
        path = "single_k"
    else:
        path = "tiled"

    # Megacore (v7x has 2 TCs): make sure the parallel grid has >= 2 blocks.
    gn_eff = 1 if path == "resident" else Np // tn
    if (Mp // tm) * gn_eff < 2 and Mp >= 256:
        tm = _largest_tile(Mp, Mp // 2)
    gm = Mp // tm
    gn = Np // tn

    cost = pl.CostEstimate(
        flops=2 * M * K * true_n,
        transcendentals=0,
        bytes_accessed=M * K * csize + K * true_n * csize + M * true_n * osize,
    )

    if path == "resident":
        est = (2 * tm * Kp * csize + 2 * Kp * Np * csize
               + 2 * tm * Np * osize + tm * Np * 4)
        grid = (gm,)
        in_specs = [
            pl.BlockSpec((tm, Kp), lambda i: (i, 0)),
            pl.BlockSpec((Kp, Np), lambda i: (0, 0)),   # constant -> stays resident
        ]
        out_specs = pl.BlockSpec((tm, Np), lambda i: (i, 0))
        scratch = []
        semantics = ("parallel",)
        kernel = _relu_mm_kernel
    elif path == "single_k":
        est = (2 * tm * Kp * csize + 2 * Kp * tn * csize
               + 2 * tm * tn * osize + tm * tn * 4)
        grid = (gm, gn)
        in_specs = [
            pl.BlockSpec((tm, Kp), lambda i, j: (i, 0)),
            pl.BlockSpec((Kp, tn), lambda i, j: (0, j)),
        ]
        out_specs = pl.BlockSpec((tm, tn), lambda i, j: (i, j))
        scratch = []
        semantics = ("parallel", "parallel")
        kernel = _relu_mm_kernel
    else:  # general K-reduction fallback
        tk = _largest_tile(Kp, tile_k)
        est = (2 * tm * tk * csize + 2 * tk * tn * csize
               + 2 * tm * tn * osize + tm * tn * 4)
        while est > cap and tk > 128:
            tk = _largest_tile(Kp, max(tk // 2, 128))
            est = (2 * tm * tk * csize + 2 * tk * tn * csize
                   + 2 * tm * tn * osize + tm * tn * 4)
        gk = Kp // tk
        grid = (gm, gn, gk)
        in_specs = [
            pl.BlockSpec((tm, tk), lambda i, j, k: (i, k)),
            pl.BlockSpec((tk, tn), lambda i, j, k: (k, j)),
        ]
        out_specs = pl.BlockSpec((tm, tn), lambda i, j, k: (i, j))
        scratch = [pltpu.VMEM((tm, tn), jnp.float32)]
        semantics = ("parallel", "parallel", "arbitrary")
        kernel = _relu_mm_acc_kernel

    vmem_limit = min(max(est + est // 2, 32 * 1024 * 1024), cap)

    out_padded = pl.pallas_call(
        kernel,
        out_shape=jax.ShapeDtypeStruct((Mp, Np), out_dtype),
        grid_spec=pltpu.PrefetchScalarGridSpec(
            num_scalar_prefetch=0,
            grid=grid,
            in_specs=in_specs,
            out_specs=out_specs,
            scratch_shapes=scratch,
        ),
        compiler_params=pltpu.CompilerParams(
            dimension_semantics=semantics,
            vmem_limit_bytes=vmem_limit,
        ),
        cost_estimate=cost,
    )(xc, w_padded)

    if (Mp, Np) != (M, true_n):
        out_padded = out_padded[:M, :true_n]
    return out_padded


def prepare_weight(weight, compute_dtype=jnp.bfloat16):
    """Cast + 128-pad the weight once (hoist out of the per-forward path)."""
    K, N = weight.shape
    Kp, Np = _round_up(K, 128), _round_up(N, 128)
    wc = jnp.asarray(weight, compute_dtype)
    if (Kp, Np) != (K, N):
        wc = jnp.pad(wc, ((0, Kp - K), (0, Np - N)))
    return wc, N


def make_linear_forward(
    weight,
    *,
    compute_dtype=jnp.bfloat16,
    out_dtype=None,
    tile_m: int = 512,
    tile_n: int = 512,
    tile_k: int = 2048,
):
    """Returns a jitted forward(x) with the weight pre-cast / pre-padded."""
    w_padded, true_n = prepare_weight(weight, compute_dtype)

    @jax.jit
    def fwd(x):
        od = out_dtype if out_dtype is not None else x.dtype
        return _forward_prepared(
            x, w_padded, true_n,
            out_dtype=od, tile_m=tile_m, tile_n=tile_n, tile_k=tile_k,
            compute_dtype=compute_dtype,
        )

    return fwd


def linear_forward(
    x,
    weight,
    *,
    tile_m: int = 512,
    tile_n: int = 512,
    tile_k: int = 2048,
    compute_dtype=jnp.bfloat16,   # NOTE: f32 inputs are downcast unless f32 passed
    out_dtype=None,
    _force_path=None,
):
    """act(x @ weight) with act = relu, bias = None (module eval-mode defaults)."""
    K, N = weight.shape
    assert x.shape[1] == K, "inner dims must match"
    w_padded, true_n = prepare_weight(weight, compute_dtype)
    od = out_dtype if out_dtype is not None else x.dtype
    return _forward_prepared(
        x, w_padded, true_n,
        out_dtype=od, tile_m=tile_m, tile_n=tile_n, tile_k=tile_k,
        compute_dtype=compute_dtype, _force_path=_force_path,
    )


def xavier_uniform(key, shape, dtype=jnp.float32):
    fan_in, fan_out = shape
    bound = math.sqrt(6.0 / (fan_in + fan_out))
    return jax.random.uniform(key, shape, dtype=dtype, minval=-bound, maxval=bound)


# TODO(synk): training-mode dropout / sparse_dropout and sparse-tuple inputs are
# not implemented (forward here corresponds to eval mode with dense inputs).

if __name__ == "__main__":
    key = jax.random.PRNGKey(0)
    k1, k2, k3, k4, k5, k6 = jax.random.split(key, 6)

    # --- Test 1: aligned shapes, f32 compute, hoisted-weight wrapper
    #             (weight-resident fast path; megacore-split M grid) ---
    M1, K1, N1 = 512, 256, 256
    x1 = jax.random.normal(k1, (M1, K1), dtype=jnp.float32)
    w1 = xavier_uniform(k2, (K1, N1))
    fwd1 = make_linear_forward(w1, compute_dtype=jnp.float32)
    out1 = jax.block_until_ready(fwd1(x1))
    ref1 = jnp.maximum(x1 @ w1, 0.0)
    assert out1.shape == (M1, N1)
    assert jnp.allclose(out1, ref1, atol=1e-5, rtol=1e-5)

    # --- Test 2: unaligned shapes, bf16 compute (128-only padding + slice) ---
    M2, K2, N2 = 300, 200, 96
    x2 = jax.random.normal(k3, (M2, K2), dtype=jnp.float32)
    w2 = xavier_uniform(k4, (K2, N2))
    out2 = jax.block_until_ready(linear_forward(x2, w2, compute_dtype=jnp.bfloat16))
    ref2_bf16 = jnp.maximum(
        jnp.dot(
            x2.astype(jnp.bfloat16),
            w2.astype(jnp.bfloat16),
            preferred_element_type=jnp.float32,
        ),
        0.0,
    )
    ref2_f32 = jnp.maximum(x2 @ w2, 0.0)
    assert out2.shape == (M2, N2)
    assert jnp.allclose(out2, ref2_bf16, atol=1e-3, rtol=1e-3)
    assert jnp.allclose(out2, ref2_f32, atol=5e-2, rtol=5e-2)

    # --- Test 3: force the general K-reduction (accumulator) path ---
    M3, K3, N3 = 256, 384, 256
    x3 = jax.random.normal(k5, (M3, K3), dtype=jnp.float32)
    w3 = xavier_uniform(k6, (K3, N3))
    out3 = jax.block_until_ready(
        linear_forward(
            x3, w3, compute_dtype=jnp.float32,
            tile_m=128, tile_n=128, tile_k=128, _force_path="tiled",
        )
    )
    ref3 = jnp.maximum(x3 @ w3, 0.0)
    assert out3.shape == (M3, N3)
    assert jnp.allclose(out3, ref3, atol=1e-4, rtol=1e-4)

    print("KERNEL_OK")
</pallas_src>

<mosaic_0001>
module attributes {stable_mosaic.version = 11 : i64} {
  func.func @_relu_mm_kernel(%arg0: i32, %arg1: memref<256x256xf32, #tpu.memory_space<vmem>>, %arg2: memref<256x256xf32, #tpu.memory_space<vmem>>, %arg3: memref<256x256xf32, #tpu.memory_space<vmem>>) attributes {dimension_semantics = [#tpu.dimension_semantics<parallel>], iteration_bounds = array<i64: 2>, scalar_prefetch = 0 : i64, scratch_operands = 0 : i64, tpu.core_type = #tpu.core_type<tc>, window_params = [{transform_indices = @transform_0, window_bounds = array<i64: 256, 256>}, {pipeline_mode = #tpu.pipeline_mode<synchronous>, transform_indices = @transform_1, window_bounds = array<i64: 256, 256>}, {transform_indices = @transform_2, window_bounds = array<i64: 256, 256>}]} {
    %c0 = arith.constant 0 : index
    %c0_0 = arith.constant 0 : index
    %0 = vector.load %arg1[%c0, %c0_0] : memref<256x256xf32, #tpu.memory_space<vmem>>, vector<256x256xf32>
    %c0_1 = arith.constant 0 : index
    %c0_2 = arith.constant 0 : index
    %1 = vector.load %arg2[%c0_1, %c0_2] : memref<256x256xf32, #tpu.memory_space<vmem>>, vector<256x256xf32>
    %cst = arith.constant dense<0.000000e+00> : vector<256x256xf32>
    %2 = tpu.matmul %0, %1, %cst {dimension_numbers = #tpu.dot_dimension_numbers<[1], [0], [0], [1], [0, 0, 1, 1], [], []>} : vector<256x256xf32>, vector<256x256xf32>, vector<256x256xf32> -> vector<256x256xf32>
    %cst_3 = arith.constant 0.000000e+00 : f32
    %3 = vector.broadcast %cst_3 : f32 to vector<256x256xf32>
    %4 = arith.maximumf %2, %3 : vector<256x256xf32>
    %c0_4 = arith.constant 0 : index
    %c0_5 = arith.constant 0 : index
    %5 = vector.load %arg3[%c0_4, %c0_5] : memref<256x256xf32, #tpu.memory_space<vmem>>, vector<256x256xf32>
    tpu.vector_store %arg3[%c0_4, %c0_5], %4 {strides = array<i32>} : memref<256x256xf32, #tpu.memory_space<vmem>>, vector<256x256xf32>,
    return
  }
  func.func @transform_0(%arg0: i32) -> (i32, i32) {
    %c0_i32 = arith.constant 0 : i32
    %c0_i32_0 = arith.constant 0 : i32
    return %arg0, %c0_i32 : i32, i32
  }
  func.func @transform_1(%arg0: i32) -> (i32, i32) {
    %c0_i32 = arith.constant 0 : i32
    %c0_i32_0 = arith.constant 0 : i32
    %c0_i32_1 = arith.constant 0 : i32
    return %c0_i32, %c0_i32_0 : i32, i32
  }
  func.func @transform_2(%arg0: i32) -> (i32, i32) {
    %c0_i32 = arith.constant 0 : i32
    %c0_i32_0 = arith.constant 0 : i32
    return %arg0, %c0_i32 : i32, i32
  }
}

</mosaic_0001>

<bundles_post_ra>
// kernel: fwd.1
= control target key start
LH: loop header
LB: loop body
LE: loop exit
PB: predicated region body
PF: predicated region fallthrough
CT: control target
= control target key end

     0   :  { %7 = vsyncpa [#allocation3], 0  ;;  %s1404_s0 = inlined_call_operand.hbm [shape: f32[512,256], index: 0, kind: input, shape index: {}]   ;;  %s1405_s1 = inlined_call_operand.hbm [shape: f32[256,256], index: 1, kind: input, shape index: {}]   ;;  %s1406_s2 = inlined_call_operand.hbm [shape: f32[512,256], index: 2, kind: output, shape index: {}]  }
   0x1   :  { %9 = vsyncpa [#allocation3 + $0x1], 0 }
   0x2   :  { %10 = vsyncpa [#allocation6], 0 }
   0x3   :  { %11 = vsyncpa [#allocation4], 0 }
   0x4   :  { %13 = vsyncpa [#allocation4 + $0x1], 0  ;;  %s1084_s9 = smov 0   ;;  %s1086_s10 = smov 0  }
   0x5   :  { %s1088_s11 = smov 0   ;;  %s1090_s12 = smov 0  }
   0x6 LB: > { %s1105_s13 = sadd.s32 4294967295, %s1060_s12   ;;  %s791_s14 = sadd.s32 4294967294, %s1060_s12   ;;  %s1060_s12 = sphi %s1090_s12, %s1428_s12   ;;  %s1056_s11 = sphi %s1088_s11, %s1427_s11   ;;  %s1052_s10 = sphi %s1086_s10, %s1426_s10   ;;  %s1048_s9 = sphi %s1084_s9, %s1425_s9  }
   0x7   : > { %p39_p0 = scmp.ne.s32.totalorder %s1052_s10, %s1048_s9  ;;  %p1407_p1 = scmp.eq.s32.totalorder %s1105_s13, 0 }
   0x8   : > { %p90_p3 = scmp.eq.s32.totalorder %s791_s14, 1  ;;  %p792_p5 = scmp.ge.s32.totalorder %s1060_s12, 1 }
   0x9   : > { %p1114_p4 = por %p1407_p1, %p39_p0  ;;  %p97_p7 = scmp.lt.s32.totalorder %s1060_s12, 3 }
   0xa   : > { %p1119_p6 = por %p90_p3, %p39_p0  ;;  %s1062_s18 = smov [#allocation5]  }
   0xb   : > { %s1411_s15 = scalar_select %p1114_p4, 1, 0 }
   0xc   : > { %s1412_s16 = scalar_select %p1119_p6, 1, 0 }
   0xd   : > { %p1124_p8 = pnand %p792_p5, %p97_p7  ;;  %s109_s19 = sshll.u32 %s1062_s18, 4  ;;  %s110_s19 = int_to_ptr.vmem [resolvable:$true] %s109_s19 }
   0xe   : > { %s1138_s21 = sadd.s32 1, %s1060_s12   ;;  %s26_s22 = sadd.s32 1, %s1056_s11 }
   0xf   : > { %s1413_s17 = scalar_select %p1124_p8, 1, 0 }
  0x10   : > { %p885_p9 = pneg %p1124_p8  ;;  %s23_s23 = ssub.s32 %s1060_s12, %s1138_s21 }
  0x11   : > { %s949_s24 = scalar_lea.vmem %s110_s19, 8192  ;;  %p957_p5 = scmp.lt.s32.totalorder %s110_s19, %s110_s19 }
  0x12   : > { %p1133_p11 = pnand %p885_p9, %p1407_p1  ;;  %p950_p13 = scmp.ne.s32.totalorder %s110_s19, %s949_s24 }
  0x13   : > { %p958_p7 = scmp.lt.s32.totalorder %s949_s24, %s949_s24 }
  0x14   : > { %p940_p12 = pneg %p1133_p11 }
  0x15   : > { %p959_p10 = por %p958_p7, %p957_p5 }
  0x16   : > { %p952_p0 = pnand %p950_p13, %p940_p12 }
  0x18   : > { %p953_p3 = pneg %p952_p0 }
  0x1a   : > { %p960_p2 = pnand %p959_p10, %p953_p3 }
  0x1c   : > { %963 = shalt.err (!%p960_p2)
}
  0x1d   : > { %s1063_s25 = smov 256   ;;  %s1064_s26 = smov 16  }
  0x1e   : > { %888 = dma.hbm_to_vmem [thread:$0]  (!%p1133_p11), %s1405_s1, 8192, %s110_s19, [#allocation6], %s1063_s25, %s1063_s25, %s1064_s26  }
  0x1f   : > { %p24_p2 = scmp.eq.s32.totalorder %s23_s23, 0  ;;  %p33_p9 = scmp.ne.s32.totalorder %s1056_s11, %s1052_s10 }
  0x20   : > { %p34_p10 = scmp.eq.s32.totalorder %s1060_s12, 0  ;;  %p898_p12 = scmp.lt.s32.totalorder %s1060_s12, 2 }
  0x21   : > { %s1158_s29 = scalar_select %p24_p2, %s1056_s11, %s26_s22  }
  0x22   : > { %p35_p13 = por %p34_p10, %p33_p9  ;;  %p1415_p0 = scmp.eq.s32.totalorder %s1105_s13, 1 }
  0x23   : > { %s123_s3 = sand.u32 1, %s1056_s11   ;;  %s810_s4 = sshll.u32 %s1060_s12, 13 }
  0x24   : > { %p1162_p3 = por %p1415_p0, %p33_p9  ;;  %s795_s5 = sshll.u32 %s123_s3, 9 }
  0x25   : > { %s1171_s8 = scalar_lea.hbm %s1404_s0, %s810_s4  ;;  %s127_s14 = scalar_lea.vmem [#allocation2], %s795_s5 }
  0x26   : > { %s1416_s30 = scalar_select %p1162_p3, 1, 0 }
  0x27   : > { %s135_s18 = sshll.u32 %s127_s14, 4  ;;  %p1173_p11 = pnand %p898_p12, %p35_p13  ;;  %s1177_s18 = int_to_ptr.vmem [resolvable:$true] %s135_s18 }
  0x28   : > { %s1179_s20 = scalar_lea.sflag [#allocation3], %s123_s3  ;;  %s964_s22 = scalar_lea.hbm %s1171_s8, 8192 }
  0x29   : > { %p965_p5 = scmp.ne.s32.totalorder %s1171_s8, %s964_s22  ;;  %p966_p7 = pneg %p1173_p11 }
  0x2a   : > { %s969_s27 = scalar_lea.hbm %s1404_s0, 16384  ;;  %p970_p10 = scmp.lt.s32.totalorder %s1171_s8, %s1404_s0 }
  0x2b   : > { %p967_p2 = pnand %p966_p7, %p965_p5  ;;  %p971_p12 = scmp.lt.s32.totalorder %s969_s27, %s964_s22 }
  0x2d   : > { %p968_p9 = pneg %p967_p2  ;;  %p972_p13 = por %p971_p12, %p970_p10 }
  0x2f   : > { %p973_p0 = pnand %p972_p13, %p968_p9 }
  0x31   : > { %976 = shalt.err (!%p973_p0)
}
  0x32   : > { %s977_s3 = scalar_lea.vmem %s1177_s18, 8192  ;;  %s1065_s5 = smov [#allocation2]  }
  0x33   : > { %p978_p1 = scmp.ne.s32.totalorder %s1177_s18, %s977_s3  ;;  %s982_s6 = sshll.u32 %s1065_s5, 4  ;;  %s983_s6 = int_to_ptr.vmem [resolvable:$false] %s982_s6 }
  0x34   : > { %s984_s7 = scalar_lea.vmem %s983_s6, 16384  ;;  %p985_p2 = scmp.lt.s32.totalorder %s1177_s18, %s983_s6 }
  0x35   : > { %p980_p6 = pnand %p978_p1, %p966_p7  ;;  %p986_p3 = scmp.lt.s32.totalorder %s984_s7, %s977_s3 }
  0x37   : > { %p981_p5 = pneg %p980_p6  ;;  %p987_p4 = por %p986_p3, %p985_p2 }
  0x39   : > { %p988_p8 = pnand %p987_p4, %p981_p5 }
  0x3b   : > { %991 = shalt.err (!%p988_p8)
}
  0x3c   : > { %892 = dma.hbm_to_vmem [thread:$0]  (!%p1173_p11), %s1171_s8, 8192, %s1177_s18, %s1179_s20, %s1063_s25, %s1063_s25, %s1064_s26  }
  0x3d   : > { %p1418_p1 = scmp.ne.s32.totalorder %s1413_s17, 0 }
  0x3e   : > { %s1206_s14 = sand.u32 (!%p1418_p1), 1, %s1052_s10   ;;  %p1419_p4 = scmp.ne.s32.totalorder (!%p1418_p1), %s1411_s15, 0 }
  0x3f   : > { %147 = sbr.rel (%p1418_p1) target bundleno = 409 (0x199), region = 28  ;;  %s800_s22 = sshll.u32 (!%p1418_p1), %s1206_s14, 9 }
  0x40   : > { %s150_s23 = scalar_lea.sflag (!%p1418_p1), [#allocation3], %s1206_s14  ;;  %s1212_s19 = scalar_lea.vmem (!%p1418_p1), [#allocation2], %s800_s22 }
  0x44   : > { %1035 = dma.done.wait (%p1419_p4), %s150_s23, 8192  }
  0x45   : > { %1037 = vsyncadd (%p1419_p4), %s150_s23, 4294959104  ;;  %p1420_p6 = scmp.eq.s32.totalorder %s1105_s13, 0 }
  0x47   : > { %1039 = dma.done.wait (%p1420_p6), [#allocation6], 8192   ;;  %p1421_p8 = pmov %p1420_p6 }
  0x48   : > { %v275_v0 = vld [vmem:[#allocation5 + $0xf8] sm:$0xff]  ;;  %v274_v1 = vld [vmem:[#allocation5 + $0xf0] sm:$0xff]  ;;  %v273_v2 = vld [vmem:[#allocation5 + $0xe8] sm:$0xff]  ;;  %s1288_s15 = scalar_lea.vmem [#allocation7], %s800_s22  ;;  %s812_s17 = sshll.u32 %s1105_s13, 13 }
  0x49   : > { %1041 = vsyncadd (%p1421_p8), [#allocation6], 4294959104  ;;  %308 = vmatprep.subr.mxu0 %v275_v0  ;;  %813 = vmatprep.subr.mxu1 %v275_v0  ;;  %v272_v3 = vld [vmem:[#allocation5 + $0xe0] sm:$0xff]  ;;  %v271_v4 = vld [vmem:[#allocation5 + $0xd8] sm:$0xff]  ;;  %s708_s25 = sshll.u32 %s1288_s15, 4  ;;  %s1355_s18 = scalar_lea.hbm %s1406_s2, %s812_s17  ;;  %s1357_s25 = int_to_ptr.vmem [resolvable:$true] %s708_s25 }
  0x4a   : > { %309 = vmatpush1.msra.mxu0 %v274_v1  ;;  %845 = vmatpush1.msra.mxu1 %v274_v1  ;;  %v270_v5 = vld [vmem:[#allocation5 + $0xd0] sm:$0xff]  ;;  %v269_v6 = vld [vmem:[#allocation5 + $0xc8] sm:$0xff]  ;;  %v268_v7 = vld [vmem:[#allocation5 + $0xc0] sm:$0xff]  ;;  %s694_s13 = scalar_lea.sflag [#allocation4], %s1206_s14  ;;  %s992_s20 = scalar_lea.vmem %s1357_s25, 8192 }
  0x4b   : > { %310 = vmatprep.subr.mxu0 %v273_v2  ;;  %814 = vmatprep.subr.mxu1 %v273_v2  ;;  %v267_v8 = vld [vmem:[#allocation5 + $0xb8] sm:$0xff]  ;;  %v266_v9 = vld [vmem:[#allocation5 + $0xb0] sm:$0xff]  ;;  %v265_v10 = vld [vmem:[#allocation5 + $0xa8] sm:$0xff]  ;;  %p993_p3 = scmp.ne.s32.totalorder %s1357_s25, %s992_s20  ;;  %p1422_p11 = scmp.ne.s32.totalorder %s1416_s30, 0 }
  0x4c   : > { %311 = vmatpush1.msra.mxu0 %v272_v3  ;;  %846 = vmatpush1.msra.mxu1 %v272_v3  ;;  %v264_v11 = vld [vmem:[#allocation5 + $0xa0] sm:$0xff]  ;;  %v263_v12 = vld [vmem:[#allocation5 + $0x98] sm:$0xff]  ;;  %v262_v13 = vld [vmem:[#allocation5 + $0x90] sm:$0xff]  ;;  %s1066_s24 = smov [#allocation7]  }
  0x4d   : > { %312 = vmatprep.subr.mxu0 %v271_v4  ;;  %815 = vmatprep.subr.mxu1 %v271_v4  ;;  %v261_v14 = vld [vmem:[#allocation5 + $0x88] sm:$0xff]  ;;  %v260_v15 = vld [vmem:[#allocation5 + $0x80] sm:$0xff]  ;;  %v259_v16 = vld [vmem:[#allocation5 + $0x78] sm:$0xff]  ;;  %p994_p7 = pnand %p993_p3, %p1422_p11  ;;  %s996_s27 = sshll.u32 %s1066_s24, 4  ;;  %s997_s27 = int_to_ptr.vmem [resolvable:$false] %s996_s27 }
  0x4e   : > { %313 = vmatpush1.msra.mxu0 %v270_v5  ;;  %847 = vmatpush1.msra.mxu1 %v270_v5  ;;  %v258_v17 = vld [vmem:[#allocation5 + $0x70] sm:$0xff]  ;;  %v257_v18 = vld [vmem:[#allocation5 + $0x68] sm:$0xff]  ;;  %v256_v19 = vld [vmem:[#allocation5 + $0x60] sm:$0xff]  ;;  %s998_s28 = scalar_lea.vmem %s997_s27, 16384  ;;  %p999_p10 = scmp.lt.s32.totalorder %s1357_s25, %s997_s27 }
  0x4f   : > { %314 = vmatprep.subr.mxu0 %v269_v6  ;;  %816 = vmatprep.subr.mxu1 %v269_v6  ;;  %v255_v20 = vld [vmem:[#allocation5 + $0x58] sm:$0xff]  ;;  %v254_v21 = vld [vmem:[#allocation5 + $0x50] sm:$0xff]  ;;  %v253_v22 = vld [vmem:[#allocation5 + $0x48] sm:$0xff]  ;;  %p995_p9 = pneg %p994_p7  ;;  %p1000_p12 = scmp.lt.s32.totalorder %s998_s28, %s992_s20 }
  0x50   : > { %315 = vmatpush1.msra.mxu0 %v268_v7  ;;  %848 = vmatpush1.msra.mxu1 %v268_v7  ;;  %v252_v23 = vld [vmem:[#allocation5 + $0x40] sm:$0xff]  ;;  %v251_v24 = vld [vmem:[#allocation5 + $0x38] sm:$0xff]  ;;  %v250_v25 = vld [vmem:[#allocation5 + $0x30] sm:$0xff] }
  0x51   : > { %316 = vmatprep.subr.mxu0 %v267_v8  ;;  %817 = vmatprep.subr.mxu1 %v267_v8  ;;  %v249_v26 = vld [vmem:[#allocation5 + $0x28] sm:$0xff]  ;;  %v248_v27 = vld [vmem:[#allocation5 + $0x20] sm:$0xff]  ;;  %v247_v28 = vld [vmem:[#allocation5 + $0x18] sm:$0xff]  ;;  %p1001_p13 = por %p1000_p12, %p999_p10 }
  0x52   : > { %317 = vmatpush1.msra.mxu0 %v266_v9  ;;  %849 = vmatpush1.msra.mxu1 %v266_v9  ;;  %v246_v29 = vld [vmem:[#allocation5 + $0x10] sm:$0xff]  ;;  %v245_v30 = vld [vmem:[#allocation5 + $0x8] sm:$0xff]  ;;  %v244_v31 = vld [vmem:[#allocation5] sm:$0xff] }
  0x53   : > { %318 = vmatprep.subr.mxu0 %v265_v10  ;;  %818 = vmatprep.subr.mxu1 %v265_v10  ;;  %v307_v32 = vld [vmem:[#allocation5 + $0x1f8] sm:$0xff]  ;;  %v306_v33 = vld [vmem:[#allocation5 + $0x1f0] sm:$0xff]  ;;  %v305_v34 = vld [vmem:[#allocation5 + $0x1e8] sm:$0xff]  ;;  %p1002_p0 = pnand %p1001_p13, %p995_p9 }
  0x54   : > { %319 = vmatpush1.msra.mxu0 %v264_v11  ;;  %850 = vmatpush1.msra.mxu1 %v264_v11  ;;  %v304_v35 = vld [vmem:[#allocation5 + $0x1e0] sm:$0xff]  ;;  %v303_v36 = vld [vmem:[#allocation5 + $0x1d8] sm:$0xff]  ;;  %v302_v37 = vld [vmem:[#allocation5 + $0x1d0] sm:$0xff] }
  0x55   : > { %320 = vmatprep.subr.mxu0 %v263_v12  ;;  %819 = vmatprep.subr.mxu1 %v263_v12  ;;  %v301_v38 = vld [vmem:[#allocation5 + $0x1c8] sm:$0xff]  ;;  %v300_v39 = vld [vmem:[#allocation5 + $0x1c0] sm:$0xff]  ;;  %v299_v40 = vld [vmem:[#allocation5 + $0x1b8] sm:$0xff] }
  0x56   : > { %321 = vmatpush1.msra.mxu0 %v262_v13  ;;  %851 = vmatpush1.msra.mxu1 %v262_v13  ;;  %v298_v41 = vld [vmem:[#allocation5 + $0x1b0] sm:$0xff]  ;;  %v297_v42 = vld [vmem:[#allocation5 + $0x1a8] sm:$0xff]  ;;  %v296_v43 = vld [vmem:[#allocation5 + $0x1a0] sm:$0xff] }
  0x57   : > { %322 = vmatprep.subr.mxu0 %v261_v14  ;;  %820 = vmatprep.subr.mxu1 %v261_v14  ;;  %v295_v44 = vld [vmem:[#allocation5 + $0x198] sm:$0xff]  ;;  %v294_v45 = vld [vmem:[#allocation5 + $0x190] sm:$0xff]  ;;  %v293_v46 = vld [vmem:[#allocation5 + $0x188] sm:$0xff] }
  0x58   : > { %323 = vmatpush1.msra.mxu0 %v260_v15  ;;  %852 = vmatpush1.msra.mxu1 %v260_v15  ;;  %v292_v47 = vld [vmem:[#allocation5 + $0x180] sm:$0xff]  ;;  %v291_v48 = vld [vmem:[#allocation5 + $0x178] sm:$0xff]  ;;  %v290_v49 = vld [vmem:[#allocation5 + $0x170] sm:$0xff] }
  0x59   : > { %324 = vmatprep.subr.mxu0 %v259_v16  ;;  %821 = vmatprep.subr.mxu1 %v259_v16  ;;  %v289_v50 = vld [vmem:[#allocation5 + $0x168] sm:$0xff]  ;;  %v288_v51 = vld [vmem:[#allocation5 + $0x160] sm:$0xff]  ;;  %v287_v52 = vld [vmem:[#allocation5 + $0x158] sm:$0xff] }
  0x5a   : > { %325 = vmatpush1.msra.mxu0 %v258_v17  ;;  %853 = vmatpush1.msra.mxu1 %v258_v17  ;;  %v286_v53 = vld [vmem:[#allocation5 + $0x150] sm:$0xff]  ;;  %v285_v54 = vld [vmem:[#allocation5 + $0x148] sm:$0xff]  ;;  %v284_v55 = vld [vmem:[#allocation5 + $0x140] sm:$0xff] }
  0x5b   : > { %326 = vmatprep.subr.mxu0 %v257_v18  ;;  %822 = vmatprep.subr.mxu1 %v257_v18  ;;  %v283_v56 = vld [vmem:[#allocation5 + $0x138] sm:$0xff]  ;;  %v282_v57 = vld [vmem:[#allocation5 + $0x130] sm:$0xff]  ;;  %v281_v58 = vld [vmem:[#allocation5 + $0x128] sm:$0xff] }
  0x5c   : > { %327 = vmatpush1.msra.mxu0 %v256_v19  ;;  %854 = vmatpush1.msra.mxu1 %v256_v19  ;;  %v280_v59 = vld [vmem:[#allocation5 + $0x120] sm:$0xff]  ;;  %v279_v60 = vld [vmem:[#allocation5 + $0x118] sm:$0xff]  ;;  %v278_v61 = vld [vmem:[#allocation5 + $0x110] sm:$0xff] }
  0x5d   : > { %328 = vmatprep.subr.mxu0 %v255_v20  ;;  %823 = vmatprep.subr.mxu1 %v255_v20  ;;  %v277_v62 = vld [vmem:[#allocation5 + $0x108] sm:$0xff]  ;;  %v276_v63 = vld [vmem:[#allocation5 + $0x100] sm:$0xff]  ;;  %v183_v4 = vld [vmem:[%s1212_s19 + $0x18] sm:$0xff] }
  0x5e   : > { %329 = vmatpush1.msra.mxu0 %v254_v21  ;;  %855 = vmatpush1.msra.mxu1 %v254_v21  ;;  %v181_v0 = vld [vmem:[%s1212_s19 + $0x8] sm:$0xff]  ;;  %v180_v2 = vld [vmem:[%s1212_s19] sm:$0xff]  ;;  %v215_v5 = vld [vmem:[%s1212_s19 + $0x118] sm:$0xff] }
  0x5f   : > { %330 = vmatprep.subr.mxu0 %v253_v22  ;;  %824 = vmatprep.subr.mxu1 %v253_v22  ;;  %v213_v1 = vld [vmem:[%s1212_s19 + $0x108] sm:$0xff]  ;;  %v212_v3 = vld [vmem:[%s1212_s19 + $0x100] sm:$0xff]  ;;  %v182_v6 = vld [vmem:[%s1212_s19 + $0x10] sm:$0xff] }
  0x60   : > { %331 = vmatpush1.msra.mxu0 %v252_v23  ;;  %856 = vmatpush1.msra.mxu1 %v252_v23  ;;  %v214_v7 = vld [vmem:[%s1212_s19 + $0x110] sm:$0xff]  ;;  %v185_v8 = vld [vmem:[%s1212_s19 + $0x28] sm:$0xff]  ;;  %v184_v10 = vld [vmem:[%s1212_s19 + $0x20] sm:$0xff] }
  0x61   : > { %332 = vmatprep.subr.mxu0 %v251_v24  ;;  %825 = vmatprep.subr.mxu1 %v251_v24  ;;  %v217_v9 = vld [vmem:[%s1212_s19 + $0x128] sm:$0xff]  ;;  %v216_v11 = vld [vmem:[%s1212_s19 + $0x120] sm:$0xff]  ;;  %v187_v12 = vld [vmem:[%s1212_s19 + $0x38] sm:$0xff] }
  0x62   : > { %333 = vmatpush1.msra.mxu0 %v250_v25  ;;  %857 = vmatpush1.msra.mxu1 %v250_v25  ;;  %v219_v13 = vld [vmem:[%s1212_s19 + $0x138] sm:$0xff]  ;;  %v186_v14 = vld [vmem:[%s1212_s19 + $0x30] sm:$0xff]  ;;  %v189_v16 = vld [vmem:[%s1212_s19 + $0x48] sm:$0xff] }
  0x63   : > { %334 = vmatprep.subr.mxu0 %v249_v26  ;;  %826 = vmatprep.subr.mxu1 %v249_v26  ;;  %v218_v15 = vld [vmem:[%s1212_s19 + $0x130] sm:$0xff]  ;;  %v221_v17 = vld [vmem:[%s1212_s19 + $0x148] sm:$0xff]  ;;  %v188_v18 = vld [vmem:[%s1212_s19 + $0x40] sm:$0xff] }
  0x64   : > { %335 = vmatpush1.msra.mxu0 %v248_v27  ;;  %858 = vmatpush1.msra.mxu1 %v248_v27  ;;  %v220_v19 = vld [vmem:[%s1212_s19 + $0x140] sm:$0xff]  ;;  %v191_v20 = vld [vmem:[%s1212_s19 + $0x58] sm:$0xff]  ;;  %v190_v22 = vld [vmem:[%s1212_s19 + $0x50] sm:$0xff] }
  0x65   : > { %336 = vmatprep.subr.mxu0 %v247_v28  ;;  %827 = vmatprep.subr.mxu1 %v247_v28  ;;  %v223_v21 = vld [vmem:[%s1212_s19 + $0x158] sm:$0xff]  ;;  %v222_v23 = vld [vmem:[%s1212_s19 + $0x150] sm:$0xff]  ;;  %v193_v24 = vld [vmem:[%s1212_s19 + $0x68] sm:$0xff] }
  0x66   : > { %337 = vmatpush1.msra.mxu0 %v246_v29  ;;  %859 = vmatpush1.msra.mxu1 %v246_v29  ;;  %v225_v25 = vld [vmem:[%s1212_s19 + $0x168] sm:$0xff]  ;;  %v192_v26 = vld [vmem:[%s1212_s19 + $0x60] sm:$0xff]  ;;  %v195_v28 = vld [vmem:[%s1212_s19 + $0x78] sm:$0xff] }
  0x67   : > { %338 = vmatprep.subr.mxu0 %v245_v30  ;;  %828 = vmatprep.subr.mxu1 %v245_v30  ;;  %v224_v27 = vld [vmem:[%s1212_s19 + $0x160] sm:$0xff]  ;;  %v227_v29 = vld [vmem:[%s1212_s19 + $0x178] sm:$0xff]  ;;  %v194_v30 = vld [vmem:[%s1212_s19 + $0x70] sm:$0xff] }
  0x68   : > { %339 = vmatpush1.msra.mxu0 %v244_v31  ;;  %860 = vmatpush1.msra.mxu1 %v244_v31  ;;  %v226_v31 = vld [vmem:[%s1212_s19 + $0x170] sm:$0xff] }
  0x69   : > { %340 = vmatprep.subr.mxu0 %v307_v32  ;;  %829 = vmatprep.subr.mxu1 %v307_v32  ;;  %v197_v32 = vld [vmem:[%s1212_s19 + $0x88] sm:$0xff] }
  0x6a   : > { %341 = vmatpush2.msra.mxu0 %v306_v33  ;;  %861 = vmatpush2.msra.mxu1 %v306_v33  ;;  %v229_v33 = vld [vmem:[%s1212_s19 + $0x188] sm:$0xff] }
  0x6b   : > { %342 = vmatprep.subr.mxu0 %v305_v34  ;;  %830 = vmatprep.subr.mxu1 %v305_v34  ;;  %v196_v34 = vld [vmem:[%s1212_s19 + $0x80] sm:$0xff] }
  0x6c   : > { %343 = vmatpush2.msra.mxu0 %v304_v35  ;;  %862 = vmatpush2.msra.mxu1 %v304_v35  ;;  %v228_v35 = vld [vmem:[%s1212_s19 + $0x180] sm:$0xff] }
  0x6d   : > { %344 = vmatprep.subr.mxu0 %v303_v36  ;;  %831 = vmatprep.subr.mxu1 %v303_v36  ;;  %v199_v36 = vld [vmem:[%s1212_s19 + $0x98] sm:$0xff] }
  0x6e   : > { %345 = vmatpush2.msra.mxu0 %v302_v37  ;;  %863 = vmatpush2.msra.mxu1 %v302_v37  ;;  %v231_v37 = vld [vmem:[%s1212_s19 + $0x198] sm:$0xff] }
  0x6f   : > { %346 = vmatprep.subr.mxu0 %v301_v38  ;;  %832 = vmatprep.subr.mxu1 %v301_v38  ;;  %v198_v38 = vld [vmem:[%s1212_s19 + $0x90] sm:$0xff] }
  0x70   : > { %347 = vmatpush2.msra.mxu0 %v300_v39  ;;  %864 = vmatpush2.msra.mxu1 %v300_v39  ;;  %v230_v39 = vld [vmem:[%s1212_s19 + $0x190] sm:$0xff] }
  0x71   : > { %348 = vmatprep.subr.mxu0 %v299_v40  ;;  %833 = vmatprep.subr.mxu1 %v299_v40  ;;  %v201_v40 = vld [vmem:[%s1212_s19 + $0xa8] sm:$0xff] }
  0x72   : > { %349 = vmatpush2.msra.mxu0 %v298_v41  ;;  %865 = vmatpush2.msra.mxu1 %v298_v41  ;;  %v233_v41 = vld [vmem:[%s1212_s19 + $0x1a8] sm:$0xff] }
  0x73   : > { %350 = vmatprep.subr.mxu0 %v297_v42  ;;  %834 = vmatprep.subr.mxu1 %v297_v42  ;;  %v200_v42 = vld [vmem:[%s1212_s19 + $0xa0] sm:$0xff] }
  0x74   : > { %351 = vmatpush2.msra.mxu0 %v296_v43  ;;  %866 = vmatpush2.msra.mxu1 %v296_v43  ;;  %v232_v43 = vld [vmem:[%s1212_s19 + $0x1a0] sm:$0xff] }
  0x75   : > { %352 = vmatprep.subr.mxu0 %v295_v44  ;;  %835 = vmatprep.subr.mxu1 %v295_v44  ;;  %v203_v44 = vld [vmem:[%s1212_s19 + $0xb8] sm:$0xff] }
  0x76   : > { %353 = vmatpush2.msra.mxu0 %v294_v45  ;;  %867 = vmatpush2.msra.mxu1 %v294_v45  ;;  %v235_v45 = vld [vmem:[%s1212_s19 + $0x1b8] sm:$0xff] }
  0x77   : > { %354 = vmatprep.subr.mxu0 %v293_v46  ;;  %836 = vmatprep.subr.mxu1 %v293_v46  ;;  %v202_v46 = vld [vmem:[%s1212_s19 + $0xb0] sm:$0xff] }
  0x78   : > { %355 = vmatpush2.msra.mxu0 %v292_v47  ;;  %868 = vmatpush2.msra.mxu1 %v292_v47  ;;  %v234_v47 = vld [vmem:[%s1212_s19 + $0x1b0] sm:$0xff] }
  0x79   : > { %356 = vmatprep.subr.mxu0 %v291_v48  ;;  %837 = vmatprep.subr.mxu1 %v291_v48  ;;  %v205_v48 = vld [vmem:[%s1212_s19 + $0xc8] sm:$0xff] }
  0x7a   : > { %357 = vmatpush2.msra.mxu0 %v290_v49  ;;  %869 = vmatpush2.msra.mxu1 %v290_v49  ;;  %v237_v49 = vld [vmem:[%s1212_s19 + $0x1c8] sm:$0xff] }
  0x7b   : > { %358 = vmatprep.subr.mxu0 %v289_v50  ;;  %838 = vmatprep.subr.mxu1 %v289_v50  ;;  %v204_v50 = vld [vmem:[%s1212_s19 + $0xc0] sm:$0xff] }
  0x7c   : > { %359 = vmatpush2.msra.mxu0 %v288_v51  ;;  %870 = vmatpush2.msra.mxu1 %v288_v51  ;;  %v236_v51 = vld [vmem:[%s1212_s19 + $0x1c0] sm:$0xff] }
  0x7d   : > { %360 = vmatprep.subr.mxu0 %v287_v52  ;;  %839 = vmatprep.subr.mxu1 %v287_v52  ;;  %v207_v52 = vld [vmem:[%s1212_s19 + $0xd8] sm:$0xff] }
  0x7e   : > { %361 = vmatpush2.msra.mxu0 %v286_v53  ;;  %871 = vmatpush2.msra.mxu1 %v286_v53  ;;  %v239_v53 = vld [vmem:[%s1212_s19 + $0x1d8] sm:$0xff] }
  0x7f   : > { %362 = vmatprep.subr.mxu0 %v285_v54  ;;  %840 = vmatprep.subr.mxu1 %v285_v54  ;;  %v206_v54 = vld [vmem:[%s1212_s19 + $0xd0] sm:$0xff] }
  0x80   : > { %363 = vmatpush2.msra.mxu0 %v284_v55  ;;  %872 = vmatpush2.msra.mxu1 %v284_v55  ;;  %v238_v55 = vld [vmem:[%s1212_s19 + $0x1d0] sm:$0xff] }
  0x81   : > { %364 = vmatprep.subr.mxu0 %v283_v56  ;;  %841 = vmatprep.subr.mxu1 %v283_v56  ;;  %v209_v56 = vld [vmem:[%s1212_s19 + $0xe8] sm:$0xff] }
  0x82   : > { %365 = vmatpush2.msra.mxu0 %v282_v57  ;;  %873 = vmatpush2.msra.mxu1 %v282_v57  ;;  %v241_v57 = vld [vmem:[%s1212_s19 + $0x1e8] sm:$0xff] }
  0x83   : > { %366 = vmatprep.subr.mxu0 %v281_v58  ;;  %842 = vmatprep.subr.mxu1 %v281_v58  ;;  %v208_v58 = vld [vmem:[%s1212_s19 + $0xe0] sm:$0xff] }
  0x84   : > { %367 = vmatpush2.msra.mxu0 %v280_v59  ;;  %874 = vmatpush2.msra.mxu1 %v280_v59  ;;  %v240_v59 = vld [vmem:[%s1212_s19 + $0x1e0] sm:$0xff] }
  0x85   : > { %368 = vmatprep.subr.mxu0 %v279_v60  ;;  %843 = vmatprep.subr.mxu1 %v279_v60  ;;  %v211_v60 = vld [vmem:[%s1212_s19 + $0xf8] sm:$0xff] }
  0x86   : > { %369 = vmatpush2.msra.mxu0 %v278_v61  ;;  %875 = vmatpush2.msra.mxu1 %v278_v61  ;;  %v243_v61 = vld [vmem:[%s1212_s19 + $0x1f8] sm:$0xff] }
  0x87   : > { %370 = vmatprep.subr.mxu0 %v277_v62  ;;  %844 = vmatprep.subr.mxu1 %v277_v62  ;;  %v210_v62 = vld [vmem:[%s1212_s19 + $0xf0] sm:$0xff] }
  0x88   : > { %371 = vmatpush2.msra.mxu0 %v276_v63  ;;  %876 = vmatpush2.msra.mxu1 %v276_v63  ;;  %v242_v63 = vld [vmem:[%s1212_s19 + $0x1f0] sm:$0xff] }
  0x89   : > { %372 = vmatprep.mubr.f32.mxu0 %v181_v0  ;;  %468 = vmatprep.mubr.f32.mxu1 %v213_v1 }
  0x8a   : > { %373 = vmatmul.mubr.f32.vlgmr.msra.gmra.mxu0 %v180_v2  ;;  %469 = vmatmul.mubr.f32.vlgmr.msra.gmra.mxu1 %v212_v3 }
  0x8b   : > { %378 = vmatprep.mubr.f32.mxu0 %v183_v4  ;;  %474 = vmatprep.mubr.f32.mxu1 %v215_v5 }
  0x8e   : > { %379 = vmatmul.mubr.f32.gmra.mxu0 %v182_v6  ;;  %475 = vmatmul.mubr.f32.gmra.mxu1 %v214_v7 }
  0x8f   : > { %384 = vmatprep.mubr.f32.mxu0 %v185_v8  ;;  %480 = vmatprep.mubr.f32.mxu1 %v217_v9 }
  0x92   : > { %385 = vmatmul.mubr.f32.gmra.mxu0 %v184_v10  ;;  %481 = vmatmul.mubr.f32.gmra.mxu1 %v216_v11 }
  0x93   : > { %390 = vmatprep.mubr.f32.mxu0 %v187_v12  ;;  %486 = vmatprep.mubr.f32.mxu1 %v219_v13 }
  0x96   : > { %391 = vmatmul.mubr.f32.gmra.mxu0 %v186_v14  ;;  %487 = vmatmul.mubr.f32.gmra.mxu1 %v218_v15 }
  0x97   : > { %396 = vmatprep.mubr.f32.mxu0 %v189_v16  ;;  %492 = vmatprep.mubr.f32.mxu1 %v221_v17 }
  0x9a   : > { %397 = vmatmul.mubr.f32.gmra.mxu0 %v188_v18  ;;  %493 = vmatmul.mubr.f32.gmra.mxu1 %v220_v19 }
  0x9b   : > { %402 = vmatprep.mubr.f32.mxu0 %v191_v20  ;;  %498 = vmatprep.mubr.f32.mxu1 %v223_v21 }
  0x9e   : > { %403 = vmatmul.mubr.f32.gmra.mxu0 %v190_v22  ;;  %499 = vmatmul.mubr.f32.gmra.mxu1 %v222_v23 }
  0x9f   : > { %408 = vmatprep.mubr.f32.mxu0 %v193_v24  ;;  %504 = vmatprep.mubr.f32.mxu1 %v225_v25 }
  0xa2   : > { %409 = vmatmul.mubr.f32.gmra.mxu0 %v192_v26  ;;  %505 = vmatmul.mubr.f32.gmra.mxu1 %v224_v27 }
  0xa3   : > { %414 = vmatprep.mubr.f32.mxu0 %v195_v28  ;;  %510 = vmatprep.mubr.f32.mxu1 %v227_v29 }
  0xa6   : > { %415 = vmatmul.mubr.f32.gmra.mxu0 %v194_v30  ;;  %511 = vmatmul.mubr.f32.gmra.mxu1 %v226_v31 }
  0xa7   : > { %420 = vmatprep.mubr.f32.mxu0 %v197_v32  ;;  %516 = vmatprep.mubr.f32.mxu1 %v229_v33 }
  0xaa   : > { %421 = vmatmul.mubr.f32.gmra.mxu0 %v196_v34  ;;  %517 = vmatmul.mubr.f32.gmra.mxu1 %v228_v35 }
  0xab   : > { %426 = vmatprep.mubr.f32.mxu0 %v199_v36  ;;  %522 = vmatprep.mubr.f32.mxu1 %v231_v37 }
  0xae   : > { %427 = vmatmul.mubr.f32.gmra.mxu0 %v198_v38  ;;  %523 = vmatmul.mubr.f32.gmra.mxu1 %v230_v39 }
  0xaf   : > { %432 = vmatprep.mubr.f32.mxu0 %v201_v40  ;;  %528 = vmatprep.mubr.f32.mxu1 %v233_v41 }
  0xb2   : > { %433 = vmatmul.mubr.f32.gmra.mxu0 %v200_v42  ;;  %529 = vmatmul.mubr.f32.gmra.mxu1 %v232_v43 }
  0xb3   : > { %438 = vmatprep.mubr.f32.mxu0 %v203_v44  ;;  %534 = vmatprep.mubr.f32.mxu1 %v235_v45 }
  0xb6   : > { %439 = vmatmul.mubr.f32.gmra.mxu0 %v202_v46  ;;  %535 = vmatmul.mubr.f32.gmra.mxu1 %v234_v47 }
  0xb7   : > { %444 = vmatprep.mubr.f32.mxu0 %v205_v48  ;;  %540 = vmatprep.mubr.f32.mxu1 %v237_v49 }
  0xba   : > { %445 = vmatmul.mubr.f32.gmra.mxu0 %v204_v50  ;;  %541 = vmatmul.mubr.f32.gmra.mxu1 %v236_v51 }
  0xbb   : > { %450 = vmatprep.mubr.f32.mxu0 %v207_v52  ;;  %546 = vmatprep.mubr.f32.mxu1 %v239_v53 }
  0xbe   : > { %451 = vmatmul.mubr.f32.gmra.mxu0 %v206_v54  ;;  %547 = vmatmul.mubr.f32.gmra.mxu1 %v238_v55 }
  0xbf   : > { %456 = vmatprep.mubr.f32.mxu0 %v209_v56  ;;  %552 = vmatprep.mubr.f32.mxu1 %v241_v57 }
  0xc2   : > { %457 = vmatmul.mubr.f32.gmra.mxu0 %v208_v58  ;;  %553 = vmatmul.mubr.f32.gmra.mxu1 %v240_v59 }
  0xc3   : > { %462 = vmatprep.mubr.f32.mxu0 %v211_v60  ;;  %558 = vmatprep.mubr.f32.mxu1 %v243_v61 }
  0xc6   : > { %463 = vmatmul.mubr.f32.gmra.mxu0 %v210_v62  ;;  %559 = vmatmul.mubr.f32.gmra.mxu1 %v242_v63 }
 0x14a   : > { %v374_v0 = vpop.f32.mrf.mxu0  ;;  %v470_v1 = vpop.f32.mrf.mxu1 }
 0x14b   : > { %v565_v2 = vmax.f32 %v374_v0, 0.0  ;;  %v597_v3 = vmax.f32 %v470_v1, 0.0 }
 0x14c   : > { %v376_v4 = vpop.f32.mrf.mxu0  ;;  %v472_v5 = vpop.f32.mrf.mxu1 }
 0x14d   : > { %629 = vst [vmem:[%s1288_s15] sm:$0xff] %v565_v2  ;;  %661 = vst [vmem:[%s1288_s15 + $0x100] sm:$0xff] %v597_v3  ;;  %v566_v6 = vmax.f32 %v376_v4, 0.0  ;;  %v598_v7 = vmax.f32 %v472_v5, 0.0 }
 0x14e   : > { %v380_v8 = vpop.f32.mrf.mxu0  ;;  %v476_v9 = vpop.f32.mrf.mxu1 }
 0x14f   : > { %630 = vst [vmem:[%s1288_s15 + $0x8] sm:$0xff] %v566_v6  ;;  %662 = vst [vmem:[%s1288_s15 + $0x108] sm:$0xff] %v598_v7  ;;  %v567_v10 = vmax.f32 %v380_v8, 0.0  ;;  %v599_v11 = vmax.f32 %v476_v9, 0.0 }
 0x150   : > { %v382_v12 = vpop.f32.mrf.mxu0  ;;  %v478_v13 = vpop.f32.mrf.mxu1 }
 0x151   : > { %631 = vst [vmem:[%s1288_s15 + $0x10] sm:$0xff] %v567_v10  ;;  %663 = vst [vmem:[%s1288_s15 + $0x110] sm:$0xff] %v599_v11  ;;  %v568_v14 = vmax.f32 %v382_v12, 0.0  ;;  %v600_v15 = vmax.f32 %v478_v13, 0.0 }
 0x152   : > { %v386_v16 = vpop.f32.mrf.mxu0  ;;  %v482_v17 = vpop.f32.mrf.mxu1 }
 0x153   : > { %632 = vst [vmem:[%s1288_s15 + $0x18] sm:$0xff] %v568_v14  ;;  %664 = vst [vmem:[%s1288_s15 + $0x118] sm:$0xff] %v600_v15  ;;  %v569_v18 = vmax.f32 %v386_v16, 0.0  ;;  %v601_v19 = vmax.f32 %v482_v17, 0.0 }
 0x154   : > { %v388_v20 = vpop.f32.mrf.mxu0  ;;  %v484_v21 = vpop.f32.mrf.mxu1 }
 0x155   : > { %633 = vst [vmem:[%s1288_s15 + $0x20] sm:$0xff] %v569_v18  ;;  %665 = vst [vmem:[%s1288_s15 + $0x120] sm:$0xff] %v601_v19  ;;  %v570_v22 = vmax.f32 %v388_v20, 0.0  ;;  %v602_v23 = vmax.f32 %v484_v21, 0.0 }
 0x156   : > { %v392_v24 = vpop.f32.mrf.mxu0  ;;  %v488_v25 = vpop.f32.mrf.mxu1 }
 0x157   : > { %634 = vst [vmem:[%s1288_s15 + $0x28] sm:$0xff] %v570_v22  ;;  %666 = vst [vmem:[%s1288_s15 + $0x128] sm:$0xff] %v602_v23  ;;  %v571_v26 = vmax.f32 %v392_v24, 0.0  ;;  %v603_v27 = vmax.f32 %v488_v25, 0.0 }
 0x158   : > { %v394_v28 = vpop.f32.mrf.mxu0  ;;  %v490_v29 = vpop.f32.mrf.mxu1 }
 0x159   : > { %635 = vst [vmem:[%s1288_s15 + $0x30] sm:$0xff] %v571_v26  ;;  %667 = vst [vmem:[%s1288_s15 + $0x130] sm:$0xff] %v603_v27  ;;  %v572_v30 = vmax.f32 %v394_v28, 0.0  ;;  %v604_v31 = vmax.f32 %v490_v29, 0.0 }
 0x15a   : > { %v398_v32 = vpop.f32.mrf.mxu0  ;;  %v494_v33 = vpop.f32.mrf.mxu1 }
 0x15b   : > { %636 = vst [vmem:[%s1288_s15 + $0x38] sm:$0xff] %v572_v30  ;;  %668 = vst [vmem:[%s1288_s15 + $0x138] sm:$0xff] %v604_v31  ;;  %v573_v34 = vmax.f32 %v398_v32, 0.0  ;;  %v605_v35 = vmax.f32 %v494_v33, 0.0 }
 0x15c   : > { %v400_v36 = vpop.f32.mrf.mxu0  ;;  %v496_v37 = vpop.f32.mrf.mxu1 }
 0x15d   : > { %637 = vst [vmem:[%s1288_s15 + $0x40] sm:$0xff] %v573_v34  ;;  %669 = vst [vmem:[%s1288_s15 + $0x140] sm:$0xff] %v605_v35  ;;  %v574_v38 = vmax.f32 %v400_v36, 0.0  ;;  %v606_v39 = vmax.f32 %v496_v37, 0.0 }
 0x15e   : > { %v404_v40 = vpop.f32.mrf.mxu0  ;;  %v500_v41 = vpop.f32.mrf.mxu1 }
 0x15f   : > { %638 = vst [vmem:[%s1288_s15 + $0x48] sm:$0xff] %v574_v38  ;;  %670 = vst [vmem:[%s1288_s15 + $0x148] sm:$0xff] %v606_v39  ;;  %v575_v42 = vmax.f32 %v404_v40, 0.0  ;;  %v607_v43 = vmax.f32 %v500_v41, 0.0 }
 0x160   : > { %v406_v44 = vpop.f32.mrf.mxu0  ;;  %v502_v45 = vpop.f32.mrf.mxu1 }
 0x161   : > { %639 = vst [vmem:[%s1288_s15 + $0x50] sm:$0xff] %v575_v42  ;;  %671 = vst [vmem:[%s1288_s15 + $0x150] sm:$0xff] %v607_v43  ;;  %v576_v46 = vmax.f32 %v406_v44, 0.0  ;;  %v608_v47 = vmax.f32 %v502_v45, 0.0 }
 0x162   : > { %v410_v48 = vpop.f32.mrf.mxu0  ;;  %v506_v49 = vpop.f32.mrf.mxu1 }
 0x163   : > { %640 = vst [vmem:[%s1288_s15 + $0x58] sm:$0xff] %v576_v46  ;;  %672 = vst [vmem:[%s1288_s15 + $0x158] sm:$0xff] %v608_v47  ;;  %v577_v50 = vmax.f32 %v410_v48, 0.0  ;;  %v609_v51 = vmax.f32 %v506_v49, 0.0 }
 0x164   : > { %v412_v52 = vpop.f32.mrf.mxu0  ;;  %v508_v53 = vpop.f32.mrf.mxu1 }
 0x165   : > { %641 = vst [vmem:[%s1288_s15 + $0x60] sm:$0xff] %v577_v50  ;;  %673 = vst [vmem:[%s1288_s15 + $0x160] sm:$0xff] %v609_v51  ;;  %v578_v54 = vmax.f32 %v412_v52, 0.0  ;;  %v610_v55 = vmax.f32 %v508_v53, 0.0 }
 0x166   : > { %v416_v56 = vpop.f32.mrf.mxu0  ;;  %v512_v57 = vpop.f32.mrf.mxu1 }
 0x167   : > { %642 = vst [vmem:[%s1288_s15 + $0x68] sm:$0xff] %v578_v54  ;;  %674 = vst [vmem:[%s1288_s15 + $0x168] sm:$0xff] %v610_v55  ;;  %v579_v58 = vmax.f32 %v416_v56, 0.0  ;;  %v611_v59 = vmax.f32 %v512_v57, 0.0 }
 0x168   : > { %v418_v60 = vpop.f32.mrf.mxu0  ;;  %v514_v61 = vpop.f32.mrf.mxu1 }
 0x169   : > { %643 = vst [vmem:[%s1288_s15 + $0x70] sm:$0xff] %v579_v58  ;;  %675 = vst [vmem:[%s1288_s15 + $0x170] sm:$0xff] %v611_v59  ;;  %v580_v62 = vmax.f32 %v418_v60, 0.0  ;;  %v612_v63 = vmax.f32 %v514_v61, 0.0 }
 0x16a   : > { %v422_v0 = vpop.f32.mrf.mxu0  ;;  %v518_v1 = vpop.f32.mrf.mxu1 }
 0x16b   : > { %644 = vst [vmem:[%s1288_s15 + $0x78] sm:$0xff] %v580_v62  ;;  %676 = vst [vmem:[%s1288_s15 + $0x178] sm:$0xff] %v612_v63  ;;  %v581_v2 = vmax.f32 %v422_v0, 0.0  ;;  %v613_v3 = vmax.f32 %v518_v1, 0.0 }
 0x16c   : > { %v424_v4 = vpop.f32.mrf.mxu0  ;;  %v520_v5 = vpop.f32.mrf.mxu1 }
 0x16d   : > { %645 = vst [vmem:[%s1288_s15 + $0x80] sm:$0xff] %v581_v2  ;;  %677 = vst [vmem:[%s1288_s15 + $0x180] sm:$0xff] %v613_v3  ;;  %v582_v6 = vmax.f32 %v424_v4, 0.0  ;;  %v614_v7 = vmax.f32 %v520_v5, 0.0 }
 0x16e   : > { %v428_v8 = vpop.f32.mrf.mxu0  ;;  %v524_v9 = vpop.f32.mrf.mxu1 }
 0x16f   : > { %646 = vst [vmem:[%s1288_s15 + $0x88] sm:$0xff] %v582_v6  ;;  %678 = vst [vmem:[%s1288_s15 + $0x188] sm:$0xff] %v614_v7  ;;  %v583_v10 = vmax.f32 %v428_v8, 0.0  ;;  %v615_v11 = vmax.f32 %v524_v9, 0.0 }
 0x170   : > { %v430_v12 = vpop.f32.mrf.mxu0  ;;  %v526_v13 = vpop.f32.mrf.mxu1 }
 0x171   : > { %647 = vst [vmem:[%s1288_s15 + $0x90] sm:$0xff] %v583_v10  ;;  %679 = vst [vmem:[%s1288_s15 + $0x190] sm:$0xff] %v615_v11  ;;  %v584_v14 = vmax.f32 %v430_v12, 0.0  ;;  %v616_v15 = vmax.f32 %v526_v13, 0.0 }
 0x172   : > { %v434_v16 = vpop.f32.mrf.mxu0  ;;  %v530_v17 = vpop.f32.mrf.mxu1 }
 0x173   : > { %648 = vst [vmem:[%s1288_s15 + $0x98] sm:$0xff] %v584_v14  ;;  %680 = vst [vmem:[%s1288_s15 + $0x198] sm:$0xff] %v616_v15  ;;  %v585_v18 = vmax.f32 %v434_v16, 0.0  ;;  %v617_v19 = vmax.f32 %v530_v17, 0.0 }
 0x174   : > { %v436_v20 = vpop.f32.mrf.mxu0  ;;  %v532_v21 = vpop.f32.mrf.mxu1 }
 0x175   : > { %649 = vst [vmem:[%s1288_s15 + $0xa0] sm:$0xff] %v585_v18  ;;  %681 = vst [vmem:[%s1288_s15 + $0x1a0] sm:$0xff] %v617_v19  ;;  %v586_v22 = vmax.f32 %v436_v20, 0.0  ;;  %v618_v23 = vmax.f32 %v532_v21, 0.0 }
 0x176   : > { %v440_v24 = vpop.f32.mrf.mxu0  ;;  %v536_v25 = vpop.f32.mrf.mxu1 }
 0x177   : > { %650 = vst [vmem:[%s1288_s15 + $0xa8] sm:$0xff] %v586_v22  ;;  %682 = vst [vmem:[%s1288_s15 + $0x1a8] sm:$0xff] %v618_v23  ;;  %v587_v26 = vmax.f32 %v440_v24, 0.0  ;;  %v619_v27 = vmax.f32 %v536_v25, 0.0 }
 0x178   : > { %v442_v28 = vpop.f32.mrf.mxu0  ;;  %v538_v29 = vpop.f32.mrf.mxu1 }
 0x179   : > { %651 = vst [vmem:[%s1288_s15 + $0xb0] sm:$0xff] %v587_v26  ;;  %683 = vst [vmem:[%s1288_s15 + $0x1b0] sm:$0xff] %v619_v27  ;;  %v588_v30 = vmax.f32 %v442_v28, 0.0  ;;  %v620_v31 = vmax.f32 %v538_v29, 0.0 }
 0x17a   : > { %v446_v32 = vpop.f32.mrf.mxu0  ;;  %v542_v33 = vpop.f32.mrf.mxu1 }
 0x17b   : > { %652 = vst [vmem:[%s1288_s15 + $0xb8] sm:$0xff] %v588_v30  ;;  %684 = vst [vmem:[%s1288_s15 + $0x1b8] sm:$0xff] %v620_v31  ;;  %v589_v34 = vmax.f32 %v446_v32, 0.0  ;;  %v621_v35 = vmax.f32 %v542_v33, 0.0 }
 0x17c   : > { %v448_v36 = vpop.f32.mrf.mxu0  ;;  %v544_v37 = vpop.f32.mrf.mxu1 }
 0x17d   : > { %653 = vst [vmem:[%s1288_s15 + $0xc0] sm:$0xff] %v589_v34  ;;  %685 = vst [vmem:[%s1288_s15 + $0x1c0] sm:$0xff] %v621_v35  ;;  %v590_v38 = vmax.f32 %v448_v36, 0.0  ;;  %v622_v39 = vmax.f32 %v544_v37, 0.0 }
 0x17e   : > { %v452_v40 = vpop.f32.mrf.mxu0  ;;  %v548_v41 = vpop.f32.mrf.mxu1 }
 0x17f   : > { %654 = vst [vmem:[%s1288_s15 + $0xc8] sm:$0xff] %v590_v38  ;;  %686 = vst [vmem:[%s1288_s15 + $0x1c8] sm:$0xff] %v622_v39  ;;  %v591_v42 = vmax.f32 %v452_v40, 0.0  ;;  %v623_v43 = vmax.f32 %v548_v41, 0.0 }
 0x180   : > { %v454_v44 = vpop.f32.mrf.mxu0  ;;  %v550_v45 = vpop.f32.mrf.mxu1 }
 0x181   : > { %655 = vst [vmem:[%s1288_s15 + $0xd0] sm:$0xff] %v591_v42  ;;  %687 = vst [vmem:[%s1288_s15 + $0x1d0] sm:$0xff] %v623_v43  ;;  %v592_v46 = vmax.f32 %v454_v44, 0.0  ;;  %v624_v47 = vmax.f32 %v550_v45, 0.0 }
 0x182   : > { %v458_v48 = vpop.f32.mrf.mxu0  ;;  %v554_v49 = vpop.f32.mrf.mxu1 }
 0x183   : > { %656 = vst [vmem:[%s1288_s15 + $0xd8] sm:$0xff] %v592_v46  ;;  %688 = vst [vmem:[%s1288_s15 + $0x1d8] sm:$0xff] %v624_v47  ;;  %v593_v50 = vmax.f32 %v458_v48, 0.0  ;;  %v625_v51 = vmax.f32 %v554_v49, 0.0 }
 0x184   : > { %v460_v52 = vpop.f32.mrf.mxu0  ;;  %v556_v53 = vpop.f32.mrf.mxu1 }
 0x185   : > { %657 = vst [vmem:[%s1288_s15 + $0xe0] sm:$0xff] %v593_v50  ;;  %689 = vst [vmem:[%s1288_s15 + $0x1e0] sm:$0xff] %v625_v51  ;;  %v594_v54 = vmax.f32 %v460_v52, 0.0  ;;  %v626_v55 = vmax.f32 %v556_v53, 0.0 }
 0x186   : > { %v464_v56 = vpop.f32.mrf.mxu0  ;;  %v560_v57 = vpop.f32.mrf.mxu1 }
 0x187   : > { %658 = vst [vmem:[%s1288_s15 + $0xe8] sm:$0xff] %v594_v54  ;;  %690 = vst [vmem:[%s1288_s15 + $0x1e8] sm:$0xff] %v626_v55  ;;  %v595_v58 = vmax.f32 %v464_v56, 0.0  ;;  %v627_v59 = vmax.f32 %v560_v57, 0.0 }
 0x188   : > { %v466_v60 = vpop.f32.mrf.mxu0  ;;  %v562_v61 = vpop.f32.mrf.mxu1 }
 0x189   : > { %659 = vst [vmem:[%s1288_s15 + $0xf0] sm:$0xff] %v595_v58  ;;  %691 = vst [vmem:[%s1288_s15 + $0x1f0] sm:$0xff] %v627_v59  ;;  %v596_v62 = vmax.f32 %v466_v60, 0.0  ;;  %v628_v63 = vmax.f32 %v562_v61, 0.0 }
 0x18b   : > { %660 = vst [vmem:[%s1288_s15 + $0xf8] sm:$0xff] %v596_v62  ;;  %692 = vst [vmem:[%s1288_s15 + $0x1f8] sm:$0xff] %v628_v63 }
 0x18c   : > { %1005 = shalt.err (!%p1002_p0)
}
 0x18d   : > { %s1006_s4 = scalar_lea.hbm %s1355_s18, 8192  ;;  %s1010_s6 = scalar_lea.hbm %s1406_s2, 16384 }
 0x18e   : > { %p1007_p5 = scmp.ne.s32.totalorder %s1355_s18, %s1006_s4  ;;  %p1011_p4 = scmp.lt.s32.totalorder %s1355_s18, %s1406_s2 }
 0x18f   : > { %p1012_p6 = scmp.lt.s32.totalorder %s1010_s6, %s1006_s4 }
 0x190   : > { %p1008_p2 = pnand %p1007_p5, %p1422_p11 }
 0x191   : > { %p1013_p8 = por %p1012_p6, %p1011_p4 }
 0x192   : > { %p1009_p1 = pneg %p1008_p2 }
 0x194   : > { %p1014_p3 = pnand %p1013_p8, %p1009_p1 }
 0x196   : > { %1017 = shalt.err (!%p1014_p3)
}
 0x197   : > { %s1067_s23 = smov 256   ;;  %s1068_s19 = smov 16  }
 0x198   : > { %883 = dma.vmem_to_hbm [thread:$0]  (%p1422_p11), %s1357_s25, 8192, %s1355_s18, %s694_s13, %s1067_s23, %s1067_s23, %s1068_s19  }
 0x199 PF: > { %s723_s15 = sand.u32 1, %s1048_s9   ;;  %p1423_p7 = scmp.ne.s32.totalorder %s1412_s16, 0 }
 0x19a   : > { %p1424_p9 = scmp.ge.s32.totalorder %s1060_s12, 2  ;;  %s724_s17 = scalar_lea.sflag [#allocation4], %s723_s15 }
 0x19c   : > { %p894_p10 = pnand %p1424_p9, %p1423_p7 }
 0x19e   : > { %p895_p12 = pneg %p894_p10 }
 0x1a0   : > { %1043 = dma.done.wait (%p895_p12), %s724_s17, 8192  }
 0x1a1   : > { %1045 = vsyncadd (%p895_p12), %s724_s17, 4294959104  ;;  %p16_p13 = scmp.ge.s32.totalorder %s1138_s21, 4   ;;  %s1425_s9 = smov %s1052_s10 }
 0x1a2   : > { %s1426_s10 = smov %s1056_s11  ;;  %s1427_s11 = smov %s1158_s29 }
 0x1a3   : > { %s1428_s12 = smov %s1138_s21  ;;  %18 = sbr.rel (!%p16_p13) target bundleno = 6 (0x6), region = 77 }
 0x1a8   :  { %729 = vsyncpa [#allocation3], 1 }
 0x1a9   :  { %731 = vsyncpa [#allocation3 + $0x1], 1 }
 0x1aa   :  { %732 = vsyncpa [#allocation6], 1 }
 0x1ab   :  { %733 = vsyncpa [#allocation4], 1 }
 0x1ac   :  { %735 = vsyncpa [#allocation4 + $0x1], 1 }

</bundles_post_ra>
